<compile_context>
chip_gen: v6e
topology: v6e:2x2x1
jax: 0.10.0
libtpu: 0.0.40
codegen_flags: <defaults>
</compile_context>

<pallas_src>
import jax
import jax.numpy as jnp
from jax.experimental import pallas as pl
from jax.experimental.pallas import tpu as pltpu

IN_FEATURES = 784
OUT_FEATURES = 10


def fused_mlp_logsoftmax_kernel(x_ref, w_ref, o_ref):
    # x: (TB, 784) f32, w: (784, 10) f32 -> logits (TB, 10) f32 (MXU, f32 acc).
    logits = jnp.dot(x_ref[...], w_ref[...], preferred_element_type=jnp.float32)

    # Numerically stable log-softmax along the feature axis (dim=1), in f32.
    # XLU reductions + EUP exp/log sit in otherwise-idle slots under the DMA.
    m = jnp.max(logits, axis=-1, keepdims=True)
    shifted = logits - m
    lse = jnp.log(jnp.sum(jnp.exp(shifted), axis=-1, keepdims=True))
    o_ref[...] = (shifted - lse).astype(o_ref.dtype)


def linearonly_12_forward(x, w0, w1, w2, w3, *, tb=1024):
    """x: (B, 1, 28, 28) or (B, 784). wN in PyTorch nn.Linear layout (out, in)."""
    B = x.shape[0]
    x_flat = x.reshape(B, IN_FEATURES).astype(jnp.float32)

    # Exact algebraic fusion of the 4 bias-free Linear layers (f32), then
    # pre-transpose so the kernel matmul needs no in-kernel .T.
    w_fused_t = jnp.transpose(
        (w3 @ w2 @ w1 @ w0).astype(jnp.float32))           # (784, 10), ~31 KB

    # Batch tiling: single full block only for tiny batches; otherwise pick a
    # multiple-of-8 tile capped at tb, guaranteeing >= 2 grid steps so the
    # "parallel" axis can shard across v7x's two TensorCores.  No padding:
    # Pallas masks the partial last block's writeback.
    if B < 16:
        TB = B
    else:
        TB = min(tb, max(8, (B // 2) // 8 * 8))
    grid = (pl.cdiv(B, TB),)

    cost = pl.CostEstimate(
        flops=2 * B * IN_FEATURES * OUT_FEATURES,
        transcendentals=B * OUT_FEATURES,
        bytes_accessed=(B * IN_FEATURES * 4
                        + IN_FEATURES * OUT_FEATURES * 4
                        + B * OUT_FEATURES * 4),
    )

    return pl.pallas_call(
        fused_mlp_logsoftmax_kernel,
        out_shape=jax.ShapeDtypeStruct((B, OUT_FEATURES), jnp.float32),
        grid=grid,
        in_specs=[
            # x tile: one batch slab per grid step (double-buffered by Pallas).
            pl.BlockSpec((TB, IN_FEATURES), lambda i: (i, 0)),
            # fused weight: full block, constant index -> stays VMEM-resident.
            pl.BlockSpec((IN_FEATURES, OUT_FEATURES), lambda i: (0, 0)),
        ],
        out_specs=pl.BlockSpec((TB, OUT_FEATURES), lambda i: (i, 0)),
        compiler_params=pltpu.CompilerParams(
            dimension_semantics=("parallel",),
            # TB=1024 f32 double-buffered x (~6.4 MB) + 31 KB weight fits the
            # 32 MiB scoped budget on v5e (16 MiB default), v6e, and v7x.
            vmem_limit_bytes=32 * 1024 * 1024,
        ),
        cost_estimate=cost,
    )(x_flat, w_fused_t)


def init_params(key):
    # Deterministic init, PyTorch nn.Linear weight shape: (out_features, in_features)
    k0, k1, k2, k3 = jax.random.split(key, 4)

    def kaiming_uniform(k, out_f, in_f):
        bound = 1.0 / jnp.sqrt(in_f)
        return jax.random.uniform(k, (out_f, in_f), jnp.float32, -bound, bound)

    w0 = kaiming_uniform(k0, 56, 784)
    w1 = kaiming_uniform(k1, 17, 56)
    w2 = kaiming_uniform(k2, 15, 17)
    w3 = kaiming_uniform(k3, 10, 15)
    return w0, w1, w2, w3


if __name__ == "__main__":
    key = jax.random.PRNGKey(0)
    kx, kp = jax.random.split(key)

    # Small batch, MNIST-shaped input (B, 1, 28, 28) -> flattened to 784.
    B = 2
    x = jax.random.normal(kx, (B, 1, 28, 28), dtype=jnp.float32)
    w0, w1, w2, w3 = init_params(kp)

    # Jit the whole forward so the weight fusion / reshape is compiled into
    # the graph instead of eagerly dispatched per call.
    fwd = jax.jit(linearonly_12_forward)

    out = jax.block_until_ready(fwd(x, w0, w1, w2, w3))

    # Sanity: shape, normalized rows, and agreement with a pure-JAX reference
    # of the PyTorch forward (all f32 now -> tight tolerance).
    assert out.shape == (B, 10)
    probs_sum = jnp.sum(jnp.exp(out), axis=-1)
    assert bool(jnp.all(jnp.abs(probs_sum - 1.0) < 1e-4))

    ref_logits = x.reshape(B, 784) @ w0.T @ w1.T @ w2.T @ w3.T
    ref = jax.nn.log_softmax(ref_logits, axis=-1)
    assert bool(jnp.all(jnp.abs(out - ref) < 1e-3))

    print("KERNEL_OK")
</pallas_src>

<mosaic_0001>
module attributes {stable_mosaic.version = 11 : i64} {
  func.func @fused_mlp_logsoftmax_kernel(%arg0: i32, %arg1: memref<2x784xf32, #tpu.memory_space<vmem>>, %arg2: memref<784x10xf32, #tpu.memory_space<vmem>>, %arg3: memref<2x10xf32, #tpu.memory_space<vmem>>) attributes {dimension_semantics = [#tpu.dimension_semantics<parallel>], iteration_bounds = array<i64: 1>, scalar_prefetch = 0 : i64, scratch_operands = 0 : i64, tpu.core_type = #tpu.core_type<tc>, window_params = [{transform_indices = @transform_0, window_bounds = array<i64: 2, 784>}, {pipeline_mode = #tpu.pipeline_mode<synchronous>, transform_indices = @transform_1, window_bounds = array<i64: 784, 10>}, {transform_indices = @transform_2, window_bounds = array<i64: 2, 10>}]} {
    %c0 = arith.constant 0 : index
    %c0_0 = arith.constant 0 : index
    %0 = vector.load %arg1[%c0, %c0_0] : memref<2x784xf32, #tpu.memory_space<vmem>>, vector<2x784xf32>
    %c0_1 = arith.constant 0 : index
    %c0_2 = arith.constant 0 : index
    %1 = vector.load %arg2[%c0_1, %c0_2] : memref<784x10xf32, #tpu.memory_space<vmem>>, vector<784x10xf32>
    %cst = arith.constant dense<0.000000e+00> : vector<2x10xf32>
    %2 = tpu.matmul %0, %1, %cst {dimension_numbers = #tpu.dot_dimension_numbers<[1], [0], [0], [1], [0, 0, 1, 1], [], []>} : vector<2x784xf32>, vector<784x10xf32>, vector<2x10xf32> -> vector<2x10xf32>
    %cst_3 = arith.constant dense<0xFF800000> : vector<2xf32>
    %3 = vector.multi_reduction <maximumf>, %2, %cst_3 [1] : vector<2x10xf32> to vector<2xf32>
    %4 = vector.shape_cast %3 : vector<2xf32> to vector<2x1xf32>
    %5 = vector.broadcast %4 : vector<2x1xf32> to vector<2x10xf32>
    %6 = arith.subf %2, %5 : vector<2x10xf32>
    %7 = math.exp %6 : vector<2x10xf32>
    %cst_4 = arith.constant dense<0.000000e+00> : vector<2xf32>
    %8 = vector.multi_reduction <add>, %7, %cst_4 [1] : vector<2x10xf32> to vector<2xf32>
    %9 = vector.shape_cast %8 : vector<2xf32> to vector<2x1xf32>
    %10 = math.log %9 : vector<2x1xf32>
    %11 = vector.broadcast %10 : vector<2x1xf32> to vector<2x10xf32>
    %12 = arith.subf %6, %11 : vector<2x10xf32>
    %c0_5 = arith.constant 0 : index
    %c0_6 = arith.constant 0 : index
    %13 = vector.load %arg3[%c0_5, %c0_6] : memref<2x10xf32, #tpu.memory_space<vmem>>, vector<2x10xf32>
    tpu.vector_store %arg3[%c0_5, %c0_6], %12 {strides = array<i32>} : memref<2x10xf32, #tpu.memory_space<vmem>>, vector<2x10xf32>,
    return
  }
  func.func @transform_0(%arg0: i32) -> (i32, i32) {
    %c0_i32 = arith.constant 0 : i32
    %c0_i32_0 = arith.constant 0 : i32
    return %arg0, %c0_i32 : i32, i32
  }
  func.func @transform_1(%arg0: i32) -> (i32, i32) {
    %c0_i32 = arith.constant 0 : i32
    %c0_i32_0 = arith.constant 0 : i32
    %c0_i32_1 = arith.constant 0 : i32
    return %c0_i32, %c0_i32_0 : i32, i32
  }
  func.func @transform_2(%arg0: i32) -> (i32, i32) {
    %c0_i32 = arith.constant 0 : i32
    %c0_i32_0 = arith.constant 0 : i32
    return %arg0, %c0_i32 : i32, i32
  }
}

</mosaic_0001>

<bundles_post_ra>
// kernel: linearonly_12_forward.1
= control target key start
LH: loop header
LB: loop body
LE: loop exit
PB: predicated region body
PF: predicated region fallthrough
CT: control target
= control target key end

     0   :  { %v612_v30 = vmov 1983009808   ;;  %v118_v32 = vlaneseq  ;;  %s948_s0 = inlined_call_operand.vmem [shape: f32[2,784], index: 0, kind: input, shape index: {}]   ;;  %s949_s1 = inlined_call_operand.vmem [shape: f32[784,10], index: 1, kind: input, shape index: {}]   ;;  %s950_s2 = inlined_call_operand.hbm [shape: f32[2,10], index: 2, kind: output, shape index: {}]  }
   0x1   :  { %v45_v0 = vld [vmem:[%s949_s1 + $0xf8] sm:$0xff]  ;;  %v44_v4 = vld [vmem:[%s949_s1 + $0xf0] sm:$0xff]  ;;  %v43_v8 = vld [vmem:[%s949_s1 + $0xe8] sm:$0xff]  ;;  %v116_v31 = vunpack.c.l.s4 %v612_v30 }
   0x2   :  { %v77_v1 = vld [vmem:[%s949_s1 + $0x1f8] sm:$0xff]  ;;  %465 = vmatprep.subr.mxu0 %v45_v0  ;;  %v76_v5 = vld [vmem:[%s949_s1 + $0x1f0] sm:$0xff]  ;;  %v75_v9 = vld [vmem:[%s949_s1 + $0x1e8] sm:$0xff]  ;;  %v119_v42 = vshrl.u32 %v118_v32, 7 }
   0x3   :  { %v29_v2 = vld [vmem:[%s949_s1 + $0x78] sm:$0xff]  ;;  %500 = vmatprep.subr.mxu1 %v77_v1  ;;  %v28_v6 = vld [vmem:[%s949_s1 + $0x70] sm:$0xff]  ;;  %v27_v10 = vld [vmem:[%s949_s1 + $0x68] sm:$0xff]  ;;  %v117_v41 = vunpack.c.0.s8 %v116_v31 }
   0x4   :  { %v61_v3 = vld [vmem:[%s949_s1 + $0x178] sm:$0xff]  ;;  %466 = vmatpush3.msra.mxu0 %v29_v2  ;;  %v60_v7 = vld [vmem:[%s949_s1 + $0x170] sm:$0xff]  ;;  %v59_v11 = vld [vmem:[%s949_s1 + $0x168] sm:$0xff] }
   0x5   :  { %501 = vmatpush3.msra.mxu1 %v61_v3  ;;  %467 = vmatprep.subr.mxu0 %v44_v4  ;;  %v42_v12 = vld [vmem:[%s949_s1 + $0xe0] sm:$0xff]  ;;  %v41_v16 = vld [vmem:[%s949_s1 + $0xd8] sm:$0xff]  ;;  %v40_v20 = vld [vmem:[%s949_s1 + $0xd0] sm:$0xff]  ;;  %v769_v51 = vsub.s32 %v117_v41, %v119_v42 }
   0x6   :  { %502 = vmatprep.subr.mxu1 %v76_v5  ;;  %468 = vmatpush3.msra.mxu0 %v28_v6  ;;  %v74_v13 = vld [vmem:[%s949_s1 + $0x1e0] sm:$0xff]  ;;  %v73_v17 = vld [vmem:[%s949_s1 + $0x1d8] sm:$0xff]  ;;  %v72_v21 = vld [vmem:[%s949_s1 + $0x1d0] sm:$0xff] }
   0x7   :  { %503 = vmatpush3.msra.mxu1 %v60_v7  ;;  %469 = vmatprep.subr.mxu0 %v43_v8  ;;  %v26_v14 = vld [vmem:[%s949_s1 + $0x60] sm:$0xff]  ;;  %v25_v18 = vld [vmem:[%s949_s1 + $0x58] sm:$0xff]  ;;  %v24_v22 = vld [vmem:[%s949_s1 + $0x50] sm:$0xff] }
   0x8   :  { %504 = vmatprep.subr.mxu1 %v75_v9  ;;  %v58_v15 = vld [vmem:[%s949_s1 + $0x160] sm:$0xff]  ;;  %470 = vmatpush3.msra.mxu0 %v27_v10  ;;  %v57_v19 = vld [vmem:[%s949_s1 + $0x158] sm:$0xff]  ;;  %v56_v23 = vld [vmem:[%s949_s1 + $0x150] sm:$0xff] }
   0x9   :  { %505 = vmatpush3.msra.mxu1 %v59_v11  ;;  %471 = vmatprep.subr.mxu0 %v42_v12  ;;  %v39_v24 = vld [vmem:[%s949_s1 + $0xc8] sm:$0xff]  ;;  %v38_v28 = vld [vmem:[%s949_s1 + $0xc0] sm:$0xff]  ;;  %v37_v35 = vld [vmem:[%s949_s1 + $0xb8] sm:$0xff] }
   0xa   :  { %506 = vmatprep.subr.mxu1 %v74_v13  ;;  %472 = vmatpush3.msra.mxu0 %v26_v14  ;;  %v71_v25 = vld [vmem:[%s949_s1 + $0x1c8] sm:$0xff]  ;;  %v70_v29 = vld [vmem:[%s949_s1 + $0x1c0] sm:$0xff]  ;;  %v69_v36 = vld [vmem:[%s949_s1 + $0x1b8] sm:$0xff] }
   0xb   :  { %507 = vmatpush3.msra.mxu1 %v58_v15  ;;  %473 = vmatprep.subr.mxu0 %v41_v16  ;;  %v23_v26 = vld [vmem:[%s949_s1 + $0x48] sm:$0xff]  ;;  %v22_v33 = vld [vmem:[%s949_s1 + $0x40] sm:$0xff]  ;;  %v21_v37 = vld [vmem:[%s949_s1 + $0x38] sm:$0xff] }
   0xc   :  { %508 = vmatprep.subr.mxu1 %v73_v17  ;;  %474 = vmatpush3.msra.mxu0 %v25_v18  ;;  %v55_v27 = vld [vmem:[%s949_s1 + $0x148] sm:$0xff]  ;;  %v54_v34 = vld [vmem:[%s949_s1 + $0x140] sm:$0xff]  ;;  %v53_v38 = vld [vmem:[%s949_s1 + $0x138] sm:$0xff] }
   0xd   :  { %509 = vmatpush3.msra.mxu1 %v57_v19  ;;  %475 = vmatprep.subr.mxu0 %v40_v20  ;;  %v36_v39 = vld [vmem:[%s949_s1 + $0xb0] sm:$0xff]  ;;  %v35_v45 = vld [vmem:[%s949_s1 + $0xa8] sm:$0xff]  ;;  %v34_v49 = vld [vmem:[%s949_s1 + $0xa0] sm:$0xff] }
   0xe   :  { %510 = vmatprep.subr.mxu1 %v72_v21  ;;  %476 = vmatpush3.msra.mxu0 %v24_v22  ;;  %v68_v40 = vld [vmem:[%s949_s1 + $0x1b0] sm:$0xff]  ;;  %v67_v46 = vld [vmem:[%s949_s1 + $0x1a8] sm:$0xff]  ;;  %v66_v50 = vld [vmem:[%s949_s1 + $0x1a0] sm:$0xff] }
   0xf   :  { %511 = vmatpush3.msra.mxu1 %v56_v23  ;;  %477 = vmatprep.subr.mxu0 %v39_v24  ;;  %v20_v43 = vld [vmem:[%s949_s1 + $0x30] sm:$0xff]  ;;  %v19_v47 = vld [vmem:[%s949_s1 + $0x28] sm:$0xff]  ;;  %v18_v52 = vld [vmem:[%s949_s1 + $0x20] sm:$0xff] }
  0x10   :  { %512 = vmatprep.subr.mxu1 %v71_v25  ;;  %478 = vmatpush3.msra.mxu0 %v23_v26  ;;  %v52_v44 = vld [vmem:[%s949_s1 + $0x130] sm:$0xff]  ;;  %v51_v48 = vld [vmem:[%s949_s1 + $0x128] sm:$0xff]  ;;  %v50_v53 = vld [vmem:[%s949_s1 + $0x120] sm:$0xff] }
  0x11   :  { %513 = vmatpush3.msra.mxu1 %v55_v27  ;;  %479 = vmatprep.subr.mxu0 %v38_v28  ;;  %v12_v54 = vld [vmem:[%s948_s0] sm:$0xff]  ;;  %v33_v55 = vld [vmem:[%s949_s1 + $0x98] sm:$0xff]  ;;  %v32_v60 = vld [vmem:[%s949_s1 + $0x90] sm:$0xff] }
  0x12   :  { %514 = vmatprep.subr.mxu1 %v70_v29  ;;  %480 = vmatpush3.msra.mxu0 %v22_v33  ;;  %v65_v56 = vld [vmem:[%s949_s1 + $0x198] sm:$0xff]  ;;  %v114_v57 = vcombine.high %v12_v54, %v12_v54  ;;  %v64_v61 = vld [vmem:[%s949_s1 + $0x190] sm:$0xff]  ;;  %v121_v62 = vrot.slane %v12_v54, %v769_v51  ;;  %v31_v2 = vld [vmem:[%s949_s1 + $0x88] sm:$0xff] }
  0x13   :  { %515 = vmatpush3.msra.mxu1 %v54_v34  ;;  %481 = vmatprep.subr.mxu0 %v37_v35  ;;  %v17_v58 = vld [vmem:[%s949_s1 + $0x18] sm:$0xff]  ;;  %v16_v63 = vld [vmem:[%s949_s1 + $0x10] sm:$0xff]  ;;  %v63_v3 = vld [vmem:[%s949_s1 + $0x188] sm:$0xff] }
  0x14   :  { %516 = vmatprep.subr.mxu1 %v69_v36  ;;  %482 = vmatpush3.msra.mxu0 %v21_v37  ;;  %v49_v59 = vld [vmem:[%s949_s1 + $0x118] sm:$0xff]  ;;  %v48_v0 = vld [vmem:[%s949_s1 + $0x110] sm:$0xff]  ;;  %v128_v1 = vrot.slane %v114_v57, %v769_v51  ;;  %v15_v4 = vld [vmem:[%s949_s1 + $0x8] sm:$0xff]  ;;  %v129_v8 = vcombine.high %v121_v62, %v121_v62 }
  0x15   :  { %517 = vmatpush3.msra.mxu1 %v53_v38  ;;  %483 = vmatprep.subr.mxu0 %v36_v39  ;;  %v47_v5 = vld [vmem:[%s949_s1 + $0x108] sm:$0xff]  ;;  %v30_v6 = vld [vmem:[%s949_s1 + $0x80] sm:$0xff]  ;;  %v109_v12 = vld [vmem:[%s949_s1 + $0x2f8] sm:$0xff] }
  0x16   :  { %518 = vmatprep.subr.mxu1 %v68_v40  ;;  %484 = vmatpush3.msra.mxu0 %v20_v43  ;;  %v62_v7 = vld [vmem:[%s949_s1 + $0x180] sm:$0xff]  ;;  %v130_v10 = vcombine.high %v128_v1, %v128_v1  ;;  %v13_v13 = vld [vmem:[%s948_s0 + $0x8] sm:$0x3f]  ;;  %v93_v14 = vld [vmem:[%s949_s1 + $0x278] sm:$0xff] }
  0x17   :  { %519 = vmatpush3.msra.mxu1 %v52_v44  ;;  %485 = vmatprep.subr.mxu0 %v35_v45  ;;  %v14_v9 = vld [vmem:[%s949_s1] sm:$0xff]  ;;  %v131_v15 = vcombine.high %v13_v13, %v13_v13  ;;  %v840_v16 = vrot.slane %v13_v13, %v769_v51  ;;  %v111_v17 = vld [vmem:[%s949_s1 + $0x308] sm:$0xff] }
  0x18   :  { %520 = vmatprep.subr.mxu1 %v67_v46  ;;  %486 = vmatpush3.msra.mxu0 %v19_v47  ;;  %v46_v11 = vld [vmem:[%s949_s1 + $0x100] sm:$0xff] }
  0x19   :  { %521 = vmatpush3.msra.mxu1 %v51_v48  ;;  %487 = vmatprep.subr.mxu0 %v34_v49 }
  0x1a   :  { %522 = vmatprep.subr.mxu1 %v66_v50  ;;  %488 = vmatpush3.msra.mxu0 %v18_v52 }
  0x1b   :  { %523 = vmatpush3.msra.mxu1 %v50_v53  ;;  %489 = vmatprep.subr.mxu0 %v33_v55 }
  0x1c   :  { %524 = vmatprep.subr.mxu1 %v65_v56  ;;  %490 = vmatpush3.msra.mxu0 %v17_v58 }
  0x1d   :  { %525 = vmatpush3.msra.mxu1 %v49_v59  ;;  %491 = vmatprep.subr.mxu0 %v32_v60 }
  0x1e   :  { %526 = vmatprep.subr.mxu1 %v64_v61  ;;  %492 = vmatpush3.msra.mxu0 %v16_v63 }
  0x1f   :  { %527 = vmatpush3.msra.mxu1 %v48_v0  ;;  %493 = vmatprep.subr.mxu0 %v31_v2 }
  0x20   :  { %528 = vmatprep.subr.mxu1 %v63_v3  ;;  %494 = vmatpush3.msra.mxu0 %v15_v4 }
  0x21   :  { %529 = vmatpush3.msra.mxu1 %v47_v5  ;;  %495 = vmatprep.subr.mxu0 %v30_v6 }
  0x22   :  { %530 = vmatprep.subr.mxu1 %v62_v7  ;;  %496 = vmatpush3.msra.mxu0 %v14_v9 }
  0x23   :  { %220 = vmatprep.mubr.f32.mxu0 %v129_v8  ;;  %531 = vmatpush3.msra.mxu1 %v46_v11 }
  0x24   :  { %290 = vmatprep.mubr.f32.mxu1 %v130_v10 }
  0x25   :  { %7 = vsyncpa [#allocation3], 0  ;;  %221 = vmatmul.mubr.f32.vlgmr.msra.gmra.mxu0 %v121_v62  ;;  %291 = vmatmul.mubr.f32.vlgmr.msra.gmra.mxu1 %v128_v1  ;;  %v108_v18 = vld [vmem:[%s949_s1 + $0x2f0] sm:$0xff]  ;;  %v146_v20 = vcombine.high %v840_v16, %v840_v16  ;;  %v613_v21 = vmov 0.0   ;;  %v107_v22 = vld [vmem:[%s949_s1 + $0x2e8] sm:$0xff]  ;;  %v145_v25 = vrot.slane %v131_v15, %v769_v51  ;;  %vm153_vm0 = vcmask 130048  }
  0x26   :  { %535 = vmatprep.subr.mxu0 %v109_v12  ;;  %v92_v19 = vld [vmem:[%s949_s1 + $0x270] sm:$0xff]  ;;  %573 = vmatprep.subr.mxu1 %v613_v21  ;;  %v110_v23 = vld [vmem:[%s949_s1 + $0x300] sm:$0xff]  ;;  %v91_v24 = vld [vmem:[%s949_s1 + $0x268] sm:$0xff]  ;;  %vm614_vm1 = vmmov 0   ;;  %vm436_vm2 = vcmask 74752  }
  0x27   :  { %536 = vmatpush3.msra.mxu0 %v93_v14  ;;  %574 = vmatpush3.msra.mxu1 %v111_v17  ;;  %v106_v26 = vld [vmem:[%s949_s1 + $0x2e0] sm:$0xff]  ;;  %v105_v28 = vld [vmem:[%s949_s1 + $0x2d8] sm:$0xff]  ;;  %v104_v30 = vld [vmem:[%s949_s1 + $0x2d0] sm:$0xff] }
  0x28   :  { %537 = vmatprep.subr.mxu0 %v108_v18  ;;  %360 = vmatprep.mubr.f32.mxu0 %v146_v20  ;;  %v90_v27 = vld [vmem:[%s949_s1 + $0x260] sm:$0xff]  ;;  %v89_v29 = vld [vmem:[%s949_s1 + $0x258] sm:$0xff]  ;;  %v88_v31 = vld [vmem:[%s949_s1 + $0x250] sm:$0xff] }
  0x29   :  { %538 = vmatpush3.msra.mxu0 %v92_v19  ;;  %575 = vmatprep.subr.mxu1 %v613_v21  ;;  %v103_v32 = vld [vmem:[%s949_s1 + $0x2c8] sm:$0xff]  ;;  %v102_v34 = vld [vmem:[%s949_s1 + $0x2c0] sm:$0xff]  ;;  %v101_v36 = vld [vmem:[%s949_s1 + $0x2b8] sm:$0xff] }
  0x2a   :  { %539 = vmatprep.subr.mxu0 %v107_v22  ;;  %576 = vmatpush3.msra.mxu1 %v110_v23  ;;  %v87_v33 = vld [vmem:[%s949_s1 + $0x248] sm:$0xff]  ;;  %v86_v35 = vld [vmem:[%s949_s1 + $0x240] sm:$0xff]  ;;  %v85_v37 = vld [vmem:[%s949_s1 + $0x238] sm:$0xff] }
  0x2b   :  { %540 = vmatpush3.msra.mxu0 %v91_v24  ;;  %577 = vmatprep.mubr.msk.f32.mxu1 %vm614_vm1, %v613_v21  ;;  %v100_v38 = vld [vmem:[%s949_s1 + $0x2b0] sm:$0xff]  ;;  %v99_v40 = vld [vmem:[%s949_s1 + $0x2a8] sm:$0xff]  ;;  %v98_v42 = vld [vmem:[%s949_s1 + $0x2a0] sm:$0xff] }
  0x2c   :  { %541 = vmatprep.subr.mxu0 %v106_v26  ;;  %578 = vmatmul.mubr.msk.f32.vlgmr.msra.gmra.mxu1 %vm153_vm0, %v145_v25  ;;  %v84_v39 = vld [vmem:[%s949_s1 + $0x230] sm:$0xff]  ;;  %v83_v41 = vld [vmem:[%s949_s1 + $0x228] sm:$0xff]  ;;  %v82_v43 = vld [vmem:[%s949_s1 + $0x220] sm:$0xff] }
  0x2d   :  { %542 = vmatpush3.msra.mxu0 %v90_v27  ;;  %v97_v44 = vld [vmem:[%s949_s1 + $0x298] sm:$0xff]  ;;  %v96_v46 = vld [vmem:[%s949_s1 + $0x290] sm:$0xff]  ;;  %v95_v48 = vld [vmem:[%s949_s1 + $0x288] sm:$0xff] }
  0x2e   :  { %543 = vmatprep.subr.mxu0 %v105_v28  ;;  %v81_v45 = vld [vmem:[%s949_s1 + $0x218] sm:$0xff]  ;;  %v80_v47 = vld [vmem:[%s949_s1 + $0x210] sm:$0xff]  ;;  %v79_v49 = vld [vmem:[%s949_s1 + $0x208] sm:$0xff] }
  0x2f   :  { %544 = vmatpush3.msra.mxu0 %v89_v29  ;;  %v94_v50 = vld [vmem:[%s949_s1 + $0x280] sm:$0xff] }
  0x30   :  { %545 = vmatprep.subr.mxu0 %v104_v30  ;;  %v78_v51 = vld [vmem:[%s949_s1 + $0x200] sm:$0xff]  ;;  %s615_s1 = smov [#allocation2]  }
  0x31   :  { %546 = vmatpush3.msra.mxu0 %v88_v31  ;;  %s456_s10 = sshll.u32 %s615_s1, 4  ;;  %s457_s10 = int_to_ptr.vmem [resolvable:$true] %s456_s10 }
  0x32   :  { %547 = vmatprep.subr.mxu0 %v103_v32  ;;  %s590_s11 = scalar_lea.vmem %s457_s10, 32  ;;  %p595_p1 = scmp.lt.s32.totalorder %s457_s10, %s457_s10 }
  0x33   :  { %548 = vmatpush3.msra.mxu0 %v87_v33  ;;  %p591_p0 = scmp.ne.s32.totalorder %s457_s10, %s590_s11  ;;  %p596_p2 = scmp.lt.s32.totalorder %s590_s11, %s590_s11 }
  0x34   :  { %549 = vmatprep.subr.mxu0 %v102_v34 }
  0x35   :  { %550 = vmatpush3.msra.mxu0 %v86_v35  ;;  %p597_p3 = por %p596_p2, %p595_p1 }
  0x36   :  { %551 = vmatprep.subr.mxu0 %v101_v36 }
  0x37   :  { %552 = vmatpush3.msra.mxu0 %v85_v37  ;;  %p598_p4 = pnand %p597_p3, %p591_p0 }
  0x38   :  { %553 = vmatprep.subr.mxu0 %v100_v38 }
  0x39   :  { %554 = vmatpush3.msra.mxu0 %v84_v39 }
  0x3a   :  { %555 = vmatprep.subr.mxu0 %v99_v40 }
  0x3b   :  { %556 = vmatpush3.msra.mxu0 %v83_v41 }
  0x3c   :  { %557 = vmatprep.subr.mxu0 %v98_v42 }
  0x3d   :  { %558 = vmatpush3.msra.mxu0 %v82_v43 }
  0x3e   :  { %559 = vmatprep.subr.mxu0 %v97_v44 }
  0x3f   :  { %560 = vmatpush3.msra.mxu0 %v81_v45 }
  0x40   :  { %561 = vmatprep.subr.mxu0 %v96_v46 }
  0x41   :  { %562 = vmatpush3.msra.mxu0 %v80_v47 }
  0x42   :  { %563 = vmatprep.subr.mxu0 %v95_v48 }
  0x43   :  { %564 = vmatpush3.msra.mxu0 %v79_v49 }
  0x44   :  { %565 = vmatprep.subr.mxu0 %v94_v50 }
  0x45   :  { %566 = vmatpush3.msra.mxu0 %v78_v51 }
  0x46   :  { %361 = vmatmul.mubr.f32.vlgmr.msra.gmra.mxu0 %v840_v16 }
  0xe5   :  { %v532_v52 = vpop.f32.mrf.mxu1  ;;  %v497_v56 = vpop.f32.mrf.mxu0 }
  0xe7   :  { %v533_v53 = vpop.f32.mrf.mxu1  ;;  %v498_v57 = vpop.f32.mrf.mxu0 }
  0xe8   :  { %v499_v58 = vadd.f32 %v498_v57, %v497_v56  ;;  %v534_v59 = vadd.f32 %v533_v53, %v532_v52 }
  0xea   :  { %v293_v62 = vadd.f32 %v534_v59, %v499_v58 }
  0xec   :  { %v432_v54 = vpop.f32.mrf.mxu1 }
  0xee   :  { %v579_v55 = vpop.f32.mrf.mxu1 }
 0x106   :  { %v567_v60 = vpop.f32.mrf.mxu0 }
 0x108   :  { %v568_v61 = vpop.f32.mrf.mxu0 }
 0x109   :  { %v569_v63 = vadd.f32 %v568_v61, %v567_v60 }
 0x10b   :  { %v363_v0 = vadd.f32 %v569_v63, %v293_v62 }
 0x10d   :  { %v433_v1 = vadd.f32 %v432_v54, %v363_v0 }
 0x10f   :  { %v437_v2 = vsel %vm436_vm2, %v433_v1, -inf }
 0x110   :  { %438 = vmax.xlane.f32.xlu0 %v437_v2 }
 0x199   :  { %v439_v3 = vpop.xlane.xlu0 %438 }
 0x19a   :  { %v440_v4 = vsub.f32 %v433_v1, %v439_v3 }
 0x19c   :  { %v441_v5 = vmul.f32 1.442695, %v440_v4 }
 0x19e   :  { %586 = vpow2.f32 %v441_v5 }
 0x1ab   :  { %v587_v6 = vpop.eup %586 }
 0x1ac   :  { %v443_v7 = vsel %vm436_vm2, %v587_v6, 0.0 }
 0x1ad   :  { %444 = vadd.xlane.f32.xlu0 %v443_v7 }
 0x236   :  { %v445_v8 = vpop.xlane.xlu0 %444 }
 0x237   :  { %588 = vlog2.f32 %v445_v8 }
 0x244   :  { %v589_v9 = vpop.eup %588 }
 0x245   :  { %v447_v10 = vmul.f32 0.6931472, %v589_v9 }
 0x247   :  { %v448_v11 = vsub.f32 %v440_v4, %v447_v10 }
 0x249   :  { %449 = vst.msk [vmem:[#allocation2] sm:$0x3] %vm436_vm2, %v448_v11 }
 0x24a   :  { %601 = shalt.err (!%p598_p4)
}
 0x24b   :  { %459 = dma.vmem_to_hbm [thread:$0]  %s457_s10, 32, %s950_s2, [#allocation3]  }
 0x24c   :  { %610 = dma.done.wait [#allocation3], 32  }
 0x24d   :  { %611 = vsyncadd [#allocation3], 4294967264 }
 0x24e   :  { %463 = vsyncpa [#allocation3], 1 }

</bundles_post_ra>
